<compile_context>
chip_gen: v7x
topology: tpu7x:2x2x1
jax: 0.10.0
libtpu: 0.0.40
codegen_flags: <defaults>
</compile_context>

<pallas_src>
import functools

import jax
import jax.numpy as jnp
from jax.experimental import pallas as pl
from jax.experimental.pallas import tpu as pltpu

PROJ_W = 128  # one lane-aligned vreg width holding the fused v|q|k projection


def fam_kernel(x_ref, w_ref, wt_ref, b_ref, mask_ref, o_ref, *, B, N, C, cr):
    x2d = x_ref[...]                                     # (B*N, C) f32, channels-last

    # Fused v|q|k projection: one bf16 MXU matmul, f32 accumulate, f32 bias+ReLU.
    proj = jnp.dot(x2d.astype(jnp.bfloat16), w_ref[...],
                   preferred_element_type=jnp.float32)   # (B*N, PROJ_W)
    hidden = jnp.maximum(proj + b_ref[0:1, :], 0.0)

    x_v = hidden[:, 0:C]                                 # relu(bn3(v_conv(x)))  channels-last
    x_q = hidden[:, C:C + cr]                            # relu(bn1(q_conv(x)))  channels-last
    x_k = hidden[:, C + cr:C + 2 * cr]                   # relu(bn2(k_conv(x)))  channels-last

    # energy1 for all (row, col) pairs in one flat matmul; only the block
    # diagonal (same batch) survives the additive mask below.
    e1 = jnp.einsum('pk,qk->pq', x_q, x_k,
                    preferred_element_type=jnp.float32)  # (B*N, B*N)

    # energy2 = matmul(x_q.sum(dim=2), -x_q.sum(dim=1)); only meaningful under
    # B == N == cr.  Tile it across the block structure with cheap concats so
    # it broadcasts the same way the torch (B,N,N) + (N,N) add does.
    x_q3 = x_q.reshape(B, N, cr)                         # leading split: free
    s_a = jnp.sum(x_q3, axis=2)                          # (B, N)
    s_b = jnp.sum(x_q3, axis=1)                          # (B, cr)
    a_big = jnp.concatenate([s_a] * B, axis=0)           # (B*N, N)
    b_big = jnp.concatenate([s_b] * B, axis=1)           # (B, B*cr)
    e2 = jnp.dot(a_big, b_big, preferred_element_type=jnp.float32)   # (B*N, B*N)

    energy = e1 - e2 + mask_ref[...]                     # off-block -> ~-1e30

    # softmax over the key axis; off-block entries underflow to exactly 0.
    m = jnp.max(energy, axis=-1, keepdims=True)
    e = jnp.exp(energy - m)
    attention = e * pl.reciprocal(jnp.sum(e, axis=-1, keepdims=True), approx=True)
    # dim=1 renormalization: per-batch query-index sum == flat column sum since
    # off-block entries are exactly zero.  Exact divide (no compounded approx).
    attention = attention / (1e-9 + jnp.sum(attention, axis=0, keepdims=True))

    # x_r = bmm(x_v, attention) in NCL  ==  attention^T @ x_v in flat channels-last.
    x_r = jnp.einsum('pm,pc->mc', attention, x_v,
                     preferred_element_type=jnp.float32)  # (B*N, C)

    # relu(after_norm(trans_conv(x - x_r))): norm scale folded into wt, bias in b[1].
    t = jnp.dot((x2d - x_r).astype(jnp.bfloat16), wt_ref[...],
                preferred_element_type=jnp.float32)
    o_ref[...] = x2d + jnp.maximum(t + b_ref[1:2, 0:C], 0.0)   # residual


def fam_forward(x_ncl, w_fused, wt_fused, bias_pack, *, ratio=8):
    """x_ncl: (B, C, N) float32 (PyTorch Conv1d layout). Returns (B, C, N)."""
    B, C, N = x_ncl.shape
    cr = C // ratio
    if not (B == N == cr):
        raise ValueError("FAM forward only type-checks when B == N == channels//ratio")
    BN = B * N

    # Channels-last, lane-dense kernel I/O; these transposes are plain XLA ops
    # outside the kernel and fuse with producers / consumers.
    x2d = jnp.swapaxes(x_ncl, 1, 2).reshape(BN, C)

    # Additive block-diagonal mask: 0 within a batch block, -1e30 across batches.
    blk = jnp.arange(BN, dtype=jnp.int32) // N
    mask_bias = jnp.where(blk[:, None] == blk[None, :], 0.0, -1e30).astype(jnp.float32)

    vmem = pl.BlockSpec(memory_space=pltpu.MemorySpace.VMEM)
    kernel = functools.partial(fam_kernel, B=B, N=N, C=C, cr=cr)
    out2d = pl.pallas_call(
        kernel,
        out_shape=jax.ShapeDtypeStruct((BN, C), jnp.float32),
        in_specs=[vmem, vmem, vmem, vmem, vmem],
        out_specs=vmem,
        # Single resident block: at this size the kernel is launch/DMA-latency
        # bound, so no grid tiling (per perf review).
        # TODO(synk): if many independent FAM instances are evaluated, add a
        # leading "parallel" grid axis so v7x can use both TensorCores.
    )(x2d, w_fused, wt_fused, bias_pack, mask_bias)

    return jnp.swapaxes(out2d.reshape(B, N, C), 1, 2)    # back to NCL (fuses downstream)


def init_fam_params(key, channels, ratio=8):
    """Deterministic synthetic parameters matching FAM.__init__ shapes."""
    cr = channels // ratio
    ks = jax.random.split(key, 21)

    def unif(k, shape, lo=-0.1, hi=0.1):
        return jax.random.uniform(k, shape, jnp.float32, lo, hi)

    def bn_fold(kg, kb, km, kv, dim, eps=1e-5):
        gamma = 1.0 + unif(kg, (dim,))
        beta = unif(kb, (dim,))
        mean = unif(km, (dim,))
        var = 1.0 + jnp.abs(unif(kv, (dim,)))
        scale = gamma / jnp.sqrt(var + eps)
        shift = beta - mean * scale
        return scale.reshape(1, dim), shift.reshape(1, dim)

    w_qk = unif(ks[0], (cr, channels))               # q_conv.weight is k_conv.weight (shared)
    w_v = unif(ks[1], (channels, channels))
    b_v = unif(ks[2], (channels,))
    w_t = unif(ks[3], (channels, channels))
    b_t = unif(ks[4], (channels,))
    s1, h1 = bn_fold(ks[5], ks[6], ks[7], ks[8], cr)              # bn1
    s2, h2 = bn_fold(ks[9], ks[10], ks[11], ks[12], cr)           # bn2
    s3, h3 = bn_fold(ks[13], ks[14], ks[15], ks[16], channels)    # bn3
    sa, ha = bn_fold(ks[17], ks[18], ks[19], ks[20], channels)    # after_norm
    return {
        'wqk_t': w_qk.T, 'wv_t': w_v.T, 'bv': b_v.reshape(1, channels),
        'wt_t': w_t.T, 'bt': b_t.reshape(1, channels),
        's1': s1, 'h1': h1, 's2': s2, 'h2': h2,
        's3': s3, 'h3': h3, 'sa': sa, 'ha': ha,
    }


def fold_fam_params(p, channels, ratio=8, proj_w=PROJ_W):
    """Host-side folding: BN scales into conv weights (bf16 for the MXU),
    all biases/shifts packed into one small f32 array, v|q|k packed into a
    single 128-lane fused projection weight."""
    C = channels
    cr = C // ratio
    assert C + 2 * cr <= proj_w, "fused v|q|k projection must fit in one 128-lane segment"

    wv = p['wv_t'] * p['s3']                         # (C, C)
    wq = p['wqk_t'] * p['s1']                        # (C, cr)
    wk = p['wqk_t'] * p['s2']                        # (C, cr)
    wt = p['wt_t'] * p['sa']                         # (C, C)
    bv = (p['bv'] * p['s3'] + p['h3'])[0]            # (C,)
    bq = p['h1'][0]                                  # (cr,)  (q_conv has no bias)
    bk = p['h2'][0]                                  # (cr,)  (k_conv has no bias)
    bt = (p['bt'] * p['sa'] + p['ha'])[0]            # (C,)

    w_fused = jnp.zeros((C, proj_w), jnp.float32)
    w_fused = (w_fused.at[:, 0:C].set(wv)
                      .at[:, C:C + cr].set(wq)
                      .at[:, C + cr:C + 2 * cr].set(wk))

    bias_pack = jnp.zeros((2, proj_w), jnp.float32)
    bias_pack = (bias_pack.at[0, 0:C].set(bv)
                          .at[0, C:C + cr].set(bq)
                          .at[0, C + cr:C + 2 * cr].set(bk)
                          .at[1, 0:C].set(bt))

    # bf16 MXU operands (f32 accumulation in-kernel); biases stay f32.
    return {'w_fused': w_fused.astype(jnp.bfloat16),
            'wt_fused': wt.astype(jnp.bfloat16),
            'bias_pack': bias_pack}


if __name__ == "__main__":
    # Original forward only type-checks when B == N == channels // ratio.
    B, C, N, ratio = 8, 64, 8, 8
    key = jax.random.PRNGKey(0)
    kx, kp = jax.random.split(key)
    x = jax.random.normal(kx, (B, C, N), jnp.float32)

    raw = init_fam_params(kp, C, ratio)
    fused = fold_fam_params(raw, C, ratio)

    fwd = jax.jit(functools.partial(fam_forward, ratio=ratio))
    out = fwd(x, fused['w_fused'], fused['wt_fused'], fused['bias_pack'])
    out = jax.block_until_ready(out)

    assert out.shape == (B, C, N), out.shape
    assert bool(jnp.all(jnp.isfinite(out)))
    print("KERNEL_OK")
</pallas_src>

<mosaic_0001>
module attributes {stable_mosaic.version = 11 : i64} {
  func.func @fam_kernel(%arg0: memref<64x64xf32, #tpu.memory_space<vmem>>, %arg1: memref<64x128xbf16, #tpu.memory_space<vmem>>, %arg2: memref<64x64xbf16, #tpu.memory_space<vmem>>, %arg3: memref<2x128xf32, #tpu.memory_space<vmem>>, %arg4: memref<64x64xf32, #tpu.memory_space<vmem>>, %arg5: memref<64x64xf32, #tpu.memory_space<vmem>>) attributes {dimension_semantics = [], scalar_prefetch = 0 : i64, scratch_operands = 0 : i64, tpu.core_type = #tpu.core_type<tc>} {
    %c0 = arith.constant 0 : index
    %c0_0 = arith.constant 0 : index
    %0 = vector.load %arg0[%c0, %c0_0] : memref<64x64xf32, #tpu.memory_space<vmem>>, vector<64x64xf32>
    %1 = arith.truncf %0 : vector<64x64xf32> to vector<64x64xbf16>
    %c0_1 = arith.constant 0 : index
    %c0_2 = arith.constant 0 : index
    %2 = vector.load %arg1[%c0_1, %c0_2] : memref<64x128xbf16, #tpu.memory_space<vmem>>, vector<64x128xbf16>
    %cst = arith.constant dense<0.000000e+00> : vector<64x128xf32>
    %3 = tpu.matmul %1, %2, %cst {dimension_numbers = #tpu.dot_dimension_numbers<[1], [0], [0], [1], [0, 0, 1, 1], [], []>} : vector<64x64xbf16>, vector<64x128xbf16>, vector<64x128xf32> -> vector<64x128xf32>
    %c0_3 = arith.constant 0 : index
    %c0_4 = arith.constant 0 : index
    %4 = vector.load %arg3[%c0_3, %c0_4] : memref<2x128xf32, #tpu.memory_space<vmem>>, vector<1x128xf32>
    %5 = vector.broadcast %4 : vector<1x128xf32> to vector<64x128xf32>
    %6 = arith.addf %3, %5 : vector<64x128xf32>
    %cst_5 = arith.constant 0.000000e+00 : f32
    %7 = vector.broadcast %cst_5 : f32 to vector<64x128xf32>
    %8 = arith.maximumf %6, %7 : vector<64x128xf32>
    %9 = vector.extract_strided_slice %8 {offsets = [0, 0], sizes = [64, 64], strides = [1, 1]} : vector<64x128xf32> to vector<64x64xf32>
    %10 = vector.extract_strided_slice %8 {offsets = [0, 64], sizes = [64, 8], strides = [1, 1]} : vector<64x128xf32> to vector<64x8xf32>
    %11 = vector.extract_strided_slice %8 {offsets = [0, 72], sizes = [64, 8], strides = [1, 1]} : vector<64x128xf32> to vector<64x8xf32>
    "tpu.trace_start"() <{level = 10 : i32, message = "pk,qk->pq"}> : () -> ()
    %cst_6 = arith.constant dense<0.000000e+00> : vector<64x64xf32>
    %12 = tpu.matmul %10, %11, %cst_6 {dimension_numbers = #tpu.dot_dimension_numbers<[1], [1], [0], [0], [0, 0, 1, 0], [], []>} : vector<64x8xf32>, vector<64x8xf32>, vector<64x64xf32> -> vector<64x64xf32>
    "tpu.trace_stop"() : () -> ()
    %13 = vector.shape_cast %10 : vector<64x8xf32> to vector<8x8x8xf32>
    %cst_7 = arith.constant dense<0.000000e+00> : vector<8x8xf32>
    %14 = vector.multi_reduction <add>, %13, %cst_7 [2] : vector<8x8x8xf32> to vector<8x8xf32>
    %cst_8 = arith.constant dense<0.000000e+00> : vector<8x8xf32>
    %15 = vector.multi_reduction <add>, %13, %cst_8 [1] : vector<8x8x8xf32> to vector<8x8xf32>
    %16 = tpu.concatenate %14, %14, %14, %14, %14, %14, %14, %14 in 0 : vector<8x8xf32>, vector<8x8xf32>, vector<8x8xf32>, vector<8x8xf32>, vector<8x8xf32>, vector<8x8xf32>, vector<8x8xf32>, vector<8x8xf32> -> vector<64x8xf32>
    %17 = tpu.concatenate %15, %15, %15, %15, %15, %15, %15, %15 in 1 : vector<8x8xf32>, vector<8x8xf32>, vector<8x8xf32>, vector<8x8xf32>, vector<8x8xf32>, vector<8x8xf32>, vector<8x8xf32>, vector<8x8xf32> -> vector<8x64xf32>
    %cst_9 = arith.constant dense<0.000000e+00> : vector<64x64xf32>
    %18 = tpu.matmul %16, %17, %cst_9 {dimension_numbers = #tpu.dot_dimension_numbers<[1], [0], [0], [1], [0, 0, 1, 1], [], []>} : vector<64x8xf32>, vector<8x64xf32>, vector<64x64xf32> -> vector<64x64xf32>
    %19 = arith.subf %12, %18 : vector<64x64xf32>
    %c0_10 = arith.constant 0 : index
    %c0_11 = arith.constant 0 : index
    %20 = vector.load %arg4[%c0_10, %c0_11] : memref<64x64xf32, #tpu.memory_space<vmem>>, vector<64x64xf32>
    %21 = arith.addf %19, %20 : vector<64x64xf32>
    %cst_12 = arith.constant dense<0xFF800000> : vector<64xf32>
    %22 = vector.multi_reduction <maximumf>, %21, %cst_12 [1] : vector<64x64xf32> to vector<64xf32>
    %23 = vector.shape_cast %22 : vector<64xf32> to vector<64x1xf32>
    %24 = vector.broadcast %23 : vector<64x1xf32> to vector<64x64xf32>
    %25 = arith.subf %21, %24 : vector<64x64xf32>
    %26 = math.exp %25 : vector<64x64xf32>
    %cst_13 = arith.constant dense<0.000000e+00> : vector<64xf32>
    %27 = vector.multi_reduction <add>, %26, %cst_13 [1] : vector<64x64xf32> to vector<64xf32>
    %28 = vector.shape_cast %27 : vector<64xf32> to vector<64x1xf32>
    %29 = tpu.reciprocal %28 {approx = true} : vector<64x1xf32> -> vector<64x1xf32>
    %30 = vector.broadcast %29 : vector<64x1xf32> to vector<64x64xf32>
    %31 = arith.mulf %26, %30 : vector<64x64xf32>
    %cst_14 = arith.constant dense<0.000000e+00> : vector<64xf32>
    %32 = vector.multi_reduction <add>, %31, %cst_14 [0] : vector<64x64xf32> to vector<64xf32>
    %33 = vector.shape_cast %32 : vector<64xf32> to vector<1x64xf32>
    %cst_15 = arith.constant 9.99999971E-10 : f32
    %34 = vector.broadcast %cst_15 : f32 to vector<1x64xf32>
    %35 = arith.addf %34, %33 : vector<1x64xf32>
    %36 = vector.broadcast %35 : vector<1x64xf32> to vector<64x64xf32>
    %37 = arith.divf %31, %36 : vector<64x64xf32>
    "tpu.trace_start"() <{level = 10 : i32, message = "pm,pc->mc"}> : () -> ()
    %cst_16 = arith.constant dense<0.000000e+00> : vector<64x64xf32>
    %38 = tpu.matmul %37, %9, %cst_16 {dimension_numbers = #tpu.dot_dimension_numbers<[0], [0], [1], [1], [0, 1, 1, 1], [], []>} : vector<64x64xf32>, vector<64x64xf32>, vector<64x64xf32> -> vector<64x64xf32>
    "tpu.trace_stop"() : () -> ()
    %39 = arith.subf %0, %38 : vector<64x64xf32>
    %40 = arith.truncf %39 : vector<64x64xf32> to vector<64x64xbf16>
    %c0_17 = arith.constant 0 : index
    %c0_18 = arith.constant 0 : index
    %41 = vector.load %arg2[%c0_17, %c0_18] : memref<64x64xbf16, #tpu.memory_space<vmem>>, vector<64x64xbf16>
    %cst_19 = arith.constant dense<0.000000e+00> : vector<64x64xf32>
    %42 = tpu.matmul %40, %41, %cst_19 {dimension_numbers = #tpu.dot_dimension_numbers<[1], [0], [0], [1], [0, 0, 1, 1], [], []>} : vector<64x64xbf16>, vector<64x64xbf16>, vector<64x64xf32> -> vector<64x64xf32>
    %c1 = arith.constant 1 : index
    %c0_20 = arith.constant 0 : index
    %43 = vector.load %arg3[%c1, %c0_20] : memref<2x128xf32, #tpu.memory_space<vmem>>, vector<1x64xf32>
    %44 = vector.broadcast %43 : vector<1x64xf32> to vector<64x64xf32>
    %45 = arith.addf %42, %44 : vector<64x64xf32>
    %cst_21 = arith.constant 0.000000e+00 : f32
    %46 = vector.broadcast %cst_21 : f32 to vector<64x64xf32>
    %47 = arith.maximumf %45, %46 : vector<64x64xf32>
    %48 = arith.addf %0, %47 : vector<64x64xf32>
    %c0_22 = arith.constant 0 : index
    %c0_23 = arith.constant 0 : index
    %49 = vector.load %arg5[%c0_22, %c0_23] : memref<64x64xf32, #tpu.memory_space<vmem>>, vector<64x64xf32>
    tpu.vector_store %arg5[%c0_22, %c0_23], %48 {strides = array<i32>} : memref<64x64xf32, #tpu.memory_space<vmem>>, vector<64x64xf32>,
    return
  }
}

</mosaic_0001>

<bundles_post_ra>
// kernel: fam_forward.1
= control target key start
LH: loop header
LB: loop body
LE: loop exit
PB: predicated region body
PF: predicated region fallthrough
CT: control target
= control target key end

     0   :  { %10 = vsyncpa [#allocation3], 0  ;;  %s1897_s0 = inlined_call_operand.vmem [shape: f32[64,64], index: 0, kind: input, shape index: {}]   ;;  %s1898_s1 = inlined_call_operand.hbm [shape: bf16[64,128], index: 1, kind: input, shape index: {}]   ;;  %s1899_s2 = inlined_call_operand.hbm [shape: bf16[64,64], index: 2, kind: input, shape index: {}]   ;;  %s1900_s3 = inlined_call_operand.vmem [shape: f32[2,128], index: 3, kind: input, shape index: {}]   ;;  %s1901_s4 = inlined_call_operand.vmem [shape: f32[64,64], index: 4, kind: input, shape index: {}]   ;;  %s1902_s5 = inlined_call_operand.hbm [shape: f32[64,64], index: 5, kind: output, shape index: {}]  }
   0x1   :  { %11 = vsyncpa [#allocation6], 0 }
   0x2   :  { %12 = vsyncpa [#allocation4], 0  ;;  %s1546_s18 = smov [#allocation2]   ;;  %s1474_s22 = scalar_lea.hbm %s1898_s1, 512 }
   0x3   :  { %s20_s19 = sshll.u32 %s1546_s18, 4  ;;  %p1475_p0 = scmp.ne.s32.totalorder %s1898_s1, %s1474_s22  ;;  %s21_s19 = int_to_ptr.vmem [resolvable:$true] %s20_s19 }
   0x4   :  { %p1478_p1 = scmp.lt.u32.totalorder %s1474_s22, %s1898_s1 }
   0x6   :  { %p1480_p2 = pnand %p1478_p1, %p1475_p0 }
   0x8   :  { %1483 = shalt.err (!%p1480_p2)
}
   0x9   :  { %s1484_s27 = scalar_lea.vmem %s21_s19, 512  ;;  %p1489_p4 = scmp.lt.s32.totalorder %s21_s19, %s21_s19 }
   0xa   :  { %p1485_p3 = scmp.ne.s32.totalorder %s21_s19, %s1484_s27  ;;  %p1490_p5 = scmp.lt.s32.totalorder %s1484_s27, %s1484_s27 }
   0xc   :  { %p1491_p6 = por %p1490_p5, %p1489_p4 }
   0xe   :  { %p1492_p7 = pnand %p1491_p6, %p1485_p3 }
  0x10   :  { %1495 = shalt.err (!%p1492_p7)
}
  0x11   :  { %s1547_s28 = smov 64   ;;  %s1548_s29 = smov 4  }
  0x12   :  { %26 = dma.hbm_to_vmem [thread:$0]  %s1898_s1, 512, %s21_s19, [#allocation3], %s1547_s28, %s1547_s28, %s1548_s29  }
  0x13   :  { %s1549_s7 = smov [#allocation5]   ;;  %s1496_s11 = scalar_lea.hbm %s1899_s2, 512 }
  0x14   :  { %s32_s8 = sshll.u32 %s1549_s7, 4  ;;  %p1497_p8 = scmp.ne.s32.totalorder %s1899_s2, %s1496_s11  ;;  %s33_s8 = int_to_ptr.vmem [resolvable:$true] %s32_s8 }
  0x15   :  { %p1500_p9 = scmp.lt.u32.totalorder %s1496_s11, %s1899_s2 }
  0x17   :  { %p1502_p10 = pnand %p1500_p9, %p1497_p8 }
  0x19   :  { %1505 = shalt.err (!%p1502_p10)
}
  0x1a   :  { %s1506_s16 = scalar_lea.vmem %s33_s8, 512  ;;  %p1511_p12 = scmp.lt.s32.totalorder %s33_s8, %s33_s8 }
  0x1b   :  { %p1507_p11 = scmp.ne.s32.totalorder %s33_s8, %s1506_s16  ;;  %p1512_p13 = scmp.lt.s32.totalorder %s1506_s16, %s1506_s16 }
  0x1d   :  { %p1513_p0 = por %p1512_p13, %p1511_p12 }
  0x1f   :  { %p1514_p1 = pnand %p1513_p0, %p1507_p11 }
  0x21   :  { %1517 = shalt.err (!%p1514_p1)
}
  0x22   :  { %38 = dma.hbm_to_vmem [thread:$0]  %s1899_s2, 512, %s33_s8, [#allocation6], %s1547_s28, %s1547_s28, %s1548_s29  }
  0x23   :  { %1540 = dma.done.wait [#allocation3], 512  }
  0x24   :  { %1541 = vsyncadd [#allocation3], 4294966784 }
  0x25   :  { %1542 = dma.done.wait [#allocation6], 512  }
  0x26   :  { %1543 = vsyncadd [#allocation6], 4294966784  ;;  %v1424_v0 = vld [vmem:[#allocation2] sm:$0xff]   ;;  %v1425_v1 = vld [vmem:[#allocation2 + $0x8] sm:$0xff]   ;;  %vm99_vm0 = vcmask 523264   ;;  %vm395_vm1 = vcmask 589312  }
  0x27   :  { %1246 = vmatprep.subr.bf16.mxu0 %v1424_v0  ;;  %v1426_v2 = vld [vmem:[#allocation2 + $0x10] sm:$0xff]   ;;  %v1622_v3 = vld [vmem:[%s1897_s0] sm:$0xff]  ;;  %v1627_v4 = vld [vmem:[%s1897_s0 + $0x8] sm:$0xff]  ;;  %vm494_vm2 = vcmask 1041409   ;;  %s1550_s11 = smov 56   ;;  %vm496_vm3 = vcmask 1042434  }
  0x28   :  { %1247 = vmatpush3.bf16.msra.mxu0 %v1424_v0  ;;  %v58_v5 = vpack.c.bf16 %v1627_v4, %v1622_v3  ;;  %v1427_v6 = vld [vmem:[#allocation2 + $0x18] sm:$0xff]   ;;  %v1635_v7 = vld [vmem:[%s1897_s0 + $0x10] sm:$0xff]  ;;  %v1645_v9 = vld [vmem:[%s1897_s0 + $0x20] sm:$0xff]  ;;  %vm498_vm4 = vcmask 1043459   ;;  %vm500_vm5 = vcmask 1044484   ;;  %vm502_vm6 = vcmask 1045509  }
  0x29   :  { %1248 = vmatprep.subr.bf16.mxu0 %v1425_v1  ;;  %v1640_v8 = vld [vmem:[%s1897_s0 + $0x18] sm:$0xff]  ;;  %v1650_v10 = vld [vmem:[%s1897_s0 + $0x28] sm:$0xff]  ;;  %v1661_v13 = vld [vmem:[%s1897_s0 + $0x30] sm:$0xff]  ;;  %vm504_vm7 = vcmask 1046534   ;;  %vm506_vm8 = vcmask 1047559   ;;  %s1551_s12 = smov 72  }
  0x2a   :  { %1254 = vmatprep.mubr.msk.bf16.mxu0 %vm99_vm0, %v58_v5  ;;  %v59_v11 = vpack.c.bf16 %v1640_v8, %v1635_v7  ;;  %v60_v12 = vpack.c.bf16 %v1650_v10, %v1645_v9  ;;  %v1666_v14 = vld [vmem:[%s1897_s0 + $0x38] sm:$0xff]  ;;  %v1139_v16 = vld [vmem:[%s1900_s3] ss:$0 sm:$0xff]  ;;  %s1552_s13 = smov 88   ;;  %s1553_s14 = smov 80   ;;  %vm225_vm9 = vcmask 64512  }
  0x2b   :  { %v61_v15 = vpack.c.bf16 %v1666_v14, %v1661_v13  ;;  %s1554_s15 = smov 104   ;;  %s1555_s16 = smov 96   ;;  %vm1725_vm10 = vmpackc.low %vm225_vm9, %vm225_vm9  ;;  %vm548_vm11 = vcmask 130048   ;;  %vm550_vm12 = vcmask 195584   ;;  %vm552_vm13 = vcmask 261120  }
  0x2c   :  { %1249 = vmatpush3.bf16.msra.mxu0 %v1425_v1  ;;  %s1557_s1 = smov 112   ;;  %vm554_vm14 = vcmask 326656   ;;  %vm556_vm15 = vcmask 392192  }
  0x2d   :  { %1250 = vmatprep.subr.bf16.mxu0 %v1426_v2 }
  0x30   :  { %1251 = vmatpush3.bf16.msra.mxu0 %v1426_v2 }
  0x31   :  { %1252 = vmatprep.subr.bf16.mxu0 %v1427_v6 }
  0x34   :  { %1253 = vmatpush3.bf16.msra.mxu0 %v1427_v6 }
  0x37   :  { %1255 = vmatmul.mubr.msk.bf16.vlgmr.msra.gmra.mrb[0].mxu0 %vm99_vm0, %v59_v11 }
  0x38   :  { %1258 = vmatprep.mubr.msk.bf16.mxu0 %vm99_vm0, %v60_v12 }
  0x3f   :  { %1259 = vmatmul.mubr.msk.bf16.gmra.mrb[4].mxu0 %vm99_vm0, %v61_v15 }
 0x10a   :  { %v1256_v17 = vpop.f32.mrb[0].mxu0 }
 0x10b   :  { %v155_v18 = vadd.f32 %v1256_v17, %v1139_v16  ;;  %v146_v19 = vpop.f32.mrb[1].mxu0 }
 0x10c   :  { %v147_v20 = vadd.f32 %v1139_v16, %v146_v19  ;;  %v1257_v21 = vpop.f32.mrb[2].mxu0 }
 0x10d   :  { %v179_v22 = vmax.f32 %v155_v18, 0.0  ;;  %v158_v23 = vadd.f32 %v1257_v21, %v1139_v16  ;;  %v149_v24 = vpop.f32.mrb[3].mxu0 }
 0x10e   :  { %v177_v25 = vmax.f32 %v147_v20, 0.0  ;;  %v150_v26 = vadd.f32 %v1139_v16, %v149_v24 }
 0x10f   :  { %v410_v27 = vsel %vm395_vm1, %v179_v22, 0.0  ;;  %v180_v28 = vmax.f32 %v158_v23, 0.0  ;;  %197 = vrot.lane.b32.xlu1 %v179_v22, %s1547_s28 }
 0x110   :  { %v411_v29 = vrot.slane %v410_v27, 4  ;;  %v396_v30 = vsel %vm395_vm1, %v177_v25, 0.0  ;;  %v178_v31 = vmax.f32 %v150_v26, 0.0  ;;  %193 = vrot.lane.b32.xlu0 %v177_v25, %s1547_s28 }
 0x111   :  { %v397_v32 = vrot.slane %v396_v30, 4  ;;  %v417_v33 = vsel %vm395_vm1, %v180_v28, 0.0  ;;  %v1404_v34 = vpack.i.bf16 %v180_v28, %v179_v22  ;;  %v1679_v35 = vpack.c.bf16 %v180_v28, %v179_v22 }
 0x112   :  { %v412_v36 = vadd.f32 %v411_v29, %v410_v27  ;;  %v418_v37 = vrot.slane %v417_v33, 4  ;;  %v403_v38 = vsel %vm395_vm1, %v178_v31, 0.0  ;;  %v1260_v39 = vpop.f32.mrb[4].mxu0  ;;  %v1409_v40 = vpack.i.bf16 %v178_v31, %v177_v25 }
 0x113   :  { %v398_v41 = vadd.f32 %v397_v32, %v396_v30  ;;  %v404_v42 = vrot.slane %v403_v38, 4  ;;  %v171_v43 = vadd.f32 %v1260_v39, %v1139_v16  ;;  %199 = vrot.lane.b32.xlu1 %v180_v28, %s1547_s28  ;;  %v162_v44 = vpop.f32.mrb[5].mxu0  ;;  %v1683_v45 = vpack.c.bf16 %v178_v31, %v177_v25 }
 0x114   :  { %v413_v46 = vrot.slane %v412_v36, 2  ;;  %v419_v47 = vadd.f32 %v418_v37, %v417_v33  ;;  %v163_v48 = vadd.f32 %v1139_v16, %v162_v44  ;;  %v1261_v49 = vpop.f32.mrb[6].mxu0  ;;  %195 = vrot.lane.b32.xlu0 %v178_v31, %s1547_s28 }
 0x115   :  { %v399_v50 = vrot.slane %v398_v41, 2  ;;  %v405_v51 = vadd.f32 %v404_v42, %v403_v38  ;;  %v183_v52 = vmax.f32 %v171_v43, 0.0  ;;  %v174_v53 = vadd.f32 %v1261_v49, %v1139_v16  ;;  %v165_v54 = vpop.f32.mrb[7].mxu0 }
 0x116   :  { %v414_v55 = vadd.f32 %v413_v46, %v412_v36  ;;  %v420_v56 = vrot.slane %v419_v47, 2  ;;  %v181_v57 = vmax.f32 %v163_v48, 0.0  ;;  %v166_v58 = vadd.f32 %v1139_v16, %v165_v54 }
 0x117   :  { %v400_v59 = vadd.f32 %v399_v50, %v398_v41  ;;  %v406_v60 = vrot.slane %v405_v51, 2  ;;  %v438_v61 = vsel %vm395_vm1, %v183_v52, 0.0  ;;  %v184_v62 = vmax.f32 %v174_v53, 0.0  ;;  %1405 = vrot.lane.b32.xlu1 %v1404_v34, %s1550_s11 }
 0x118   :  { %v421_v63 = vadd.f32 %v420_v56, %v419_v47  ;;  %v439_v0 = vrot.slane %v438_v61, 4  ;;  %v424_v1 = vsel %vm395_vm1, %v181_v57, 0.0  ;;  %1410 = vrot.lane.b32.xlu0 %v1409_v40, %s1550_s11  ;;  %v415_v12 = vrot.slane %v414_v55, 1 }
 0x119   :  { %v401_v2 = vrot.slane %v400_v59, 1  ;;  %v407_v5 = vadd.f32 %v406_v60, %v405_v51  ;;  %v425_v6 = vrot.slane %v424_v1, 4  ;;  %v445_v11 = vsel %vm395_vm1, %v184_v62, 0.0 }
 0x11a   :  { %v440_v15 = vadd.f32 %v439_v0, %v438_v61  ;;  %v446_v16 = vrot.slane %v445_v11, 4  ;;  %v422_v17 = vrot.slane %v421_v63, 1  ;;  %v182_v20 = vmax.f32 %v166_v58, 0.0 }
 0x11b   :  { %v408_v18 = vrot.slane %v407_v5, 1  ;;  %v426_v19 = vadd.f32 %v425_v6, %v424_v1  ;;  %207 = vrot.lane.b32.xlu1 %v184_v62, %s1547_s28  ;;  %v402_v21 = vadd.f32 %v401_v2, %v400_v59  ;;  %v1414_v24 = vpack.i.bf16 %v184_v62, %v183_v52 }
 0x11c   :  { %v441_v22 = vrot.slane %v440_v15, 2  ;;  %v447_v23 = vadd.f32 %v446_v16, %v445_v11  ;;  %205 = vrot.lane.b32.xlu0 %v183_v52, %s1547_s28  ;;  %v431_v27 = vsel %vm395_vm1, %v182_v20, 0.0  ;;  %v1419_v28 = vpack.i.bf16 %v182_v20, %v181_v57 }
 0x11d   :  { %v409_v25 = vadd.f32 %v408_v18, %v407_v5  ;;  %v427_v26 = vrot.slane %v426_v19, 2  ;;  %v416_v29 = vadd.f32 %v415_v12, %v414_v55  ;;  %v432_v31 = vrot.slane %v431_v27, 4 }
 0x11e   :  { %v448_v30 = vrot.slane %v447_v23, 2  ;;  %v1694_v32 = vpack.c.bf16 %v182_v20, %v181_v57  ;;  %v423_v33 = vadd.f32 %v422_v17, %v421_v63  ;;  %v1698_v37 = vpack.c.bf16 %v184_v62, %v183_v52 }
 0x11f   :  { %v516_v34 = vsel %vm494_vm2, %v409_v25, %v402_v21  ;;  %v428_v36 = vadd.f32 %v427_v26, %v426_v19  ;;  %1415 = vrot.lane.b32.xlu1 %v1414_v24, %s1550_s11  ;;  %v433_v39 = vadd.f32 %v432_v31, %v431_v27  ;;  %v442_v40 = vadd.f32 %v441_v22, %v440_v15 }
 0x120   :  { %v517_v38 = vsel %vm496_vm3, %v416_v29, %v516_v34  ;;  %201 = vrot.lane.b32.xlu0 %v181_v57, %s1547_s28  ;;  %v449_v43 = vadd.f32 %v448_v30, %v447_v23  ;;  %vm558_vm1 = vcmask 457728  }
 0x121   :  { %v429_v41 = vrot.slane %v428_v36, 1  ;;  %v518_v42 = vsel %vm498_vm4, %v423_v33, %v517_v38  ;;  %v434_v44 = vrot.slane %v433_v39, 2  ;;  %v443_v48 = vrot.slane %v442_v40, 1 }
 0x122   :  { %v450_v50 = vrot.slane %v449_v43, 1 }
 0x123   :  { %v430_v46 = vadd.f32 %v429_v41, %v428_v36  ;;  %203 = vrot.lane.b32.xlu1 %v182_v20, %s1547_s28  ;;  %v435_v47 = vadd.f32 %v434_v44, %v433_v39  ;;  %v444_v53 = vadd.f32 %v443_v48, %v442_v40 }
 0x124   :  { %1420 = vrot.lane.b32.xlu0 %v1419_v28, %s1550_s11  ;;  %v451_v54 = vadd.f32 %v450_v50, %v449_v43  ;;  %v460_v43 = vlaneseq }
 0x125   :  { %v519_v49 = vsel %vm500_vm5, %v430_v46, %v518_v42  ;;  %v436_v51 = vrot.slane %v435_v47, 1 }
 0x126   :  { %v463_v48 = vshrl.u32 %v460_v43, 7 }
 0x127   :  { %v437_v52 = vadd.f32 %v436_v51, %v435_v47  ;;  %v461_v47 = vand.u32 127, %v460_v43 }
 0x129   :  { %v520_v55 = vsel %vm502_vm6, %v437_v52, %v519_v49  ;;  %v464_v51 = vsub.s32 %v461_v47, %v463_v48  ;;  %v678_v48 = vld [vmem:[%s1901_s4 + $0x18] sm:$0xff] }
 0x12a   :  { %v521_v56 = vsel %vm504_vm7, %v444_v53, %v520_v55 }
 0x12b   :  { %v1709_v57 = vsel %vm506_vm8, %v451_v54, %v521_v56 }
 0x12c   :  { %526 = vrot.lane.b32.xlu1 %v1709_v57, %s1551_s12  ;;  %523 = vrot.lane.b32.xlu0 %v1709_v57, %s1547_s28  ;;  %s1556_s28 = smov 120  }
 0x130   :  { %532 = vrot.lane.b32.xlu1 %v1709_v57, %s1552_s13  ;;  %529 = vrot.lane.b32.xlu0 %v1709_v57, %s1553_s14 }
 0x134   :  { %538 = vrot.lane.b32.xlu1 %v1709_v57, %s1554_s15  ;;  %535 = vrot.lane.b32.xlu0 %v1709_v57, %s1555_s16 }
 0x181   :  { %v198_v58 = vpop.permute.xlu1 %197 }
 0x182   :  { %v194_v59 = vpop.permute.xlu0 %193  ;;  %v377_v60 = vsel %vm225_vm9, %v198_v58, 0.0 }
 0x183   :  { %1278 = vmatprep.mubr.msk.f32.mxu1 %vm225_vm9, %v194_v59  ;;  %378 = vadd.xlane.f32.xlu0 %v377_v60  ;;  %v371_v63 = vsel %vm225_vm9, %v194_v59, 0.0 }
 0x185   :  { %v200_v61 = vpop.permute.xlu1 %199 }
 0x186   :  { %v196_v62 = vpop.permute.xlu0 %195  ;;  %v380_v5 = vsel %vm225_vm9, %v200_v61, 0.0 }
 0x187   :  { %372 = vadd.xlane.f32.xlu0 %v371_v63  ;;  %v374_v0 = vsel %vm225_vm9, %v196_v62, 0.0 }
 0x188   :  { %375 = vadd.xlane.f32.xlu1 %v374_v0 }
 0x189   :  { %v1406_v1 = vpop.permute.xlu1 %1405 }
 0x18a   :  { %v1411_v2 = vpop.permute.xlu0 %1410  ;;  %v1408_v6 = vunpack.i.h.bf16 %v1406_v1  ;;  %v1407_v11 = vunpack.i.l.bf16 %v1406_v1 }
 0x18b   :  { %v1413_v12 = vunpack.i.h.bf16 %v1411_v2  ;;  %v1412_v15 = vunpack.i.l.bf16 %v1411_v2  ;;  %381 = vadd.xlane.f32.xlu0 %v380_v5 }
 0x18c   :  { %v1354_v20 = vpack.c.bf16 %v1408_v6, %v1407_v11 }
 0x18d   :  { %v208_v17 = vpop.permute.xlu1 %207  ;;  %v1348_v18 = vpack.c.bf16 %v1413_v12, %v1412_v15 }
 0x18e   :  { %v206_v19 = vpop.permute.xlu0 %205  ;;  %v392_v30 = vsel %vm225_vm9, %v208_v17, 0.0 }
 0x18f   :  { %1350 = vmatprep.subr.msk.bf16.mxu1 %vm1725_vm10, %v1348_v18  ;;  %v389_v21 = vsel %vm225_vm9, %v206_v19, 0.0 }
 0x190   :  { %1353 = vmatpush3.bf16.xpose.msk.msra.mxu1 %vm1725_vm10, %v1348_v18  ;;  %390 = vadd.xlane.f32.xlu1 %v389_v21 }
 0x191   :  { %v1416_v22 = vpop.permute.xlu1 %1415  ;;  %1356 = vmatprep.subr.msk.bf16.mxu1 %vm1725_vm10, %v1354_v20 }
 0x192   :  { %v202_v23 = vpop.permute.xlu0 %201  ;;  %v1418_v33 = vunpack.i.h.bf16 %v1416_v22  ;;  %v1417_v34 = vunpack.i.l.bf16 %v1416_v22 }
 0x193   :  { %v383_v24 = vsel %vm225_vm9, %v202_v23, 0.0 }
 0x194   :  { %384 = vadd.xlane.f32.xlu1 %v383_v24  ;;  %v1366_v36 = vpack.c.bf16 %v1418_v33, %v1417_v34  ;;  %v676_v33 = vld [vmem:[%s1901_s4 + $0x8] sm:$0xff] }
 0x195   :  { %v204_v25 = vpop.permute.xlu1 %203 }
 0x196   :  { %v1421_v26 = vpop.permute.xlu0 %1420  ;;  %v386_v27 = vsel %vm225_vm9, %v204_v25, 0.0 }
 0x197   :  { %v1423_v28 = vunpack.i.h.bf16 %v1421_v26  ;;  %v1422_v29 = vunpack.i.l.bf16 %v1421_v26  ;;  %387 = vadd.xlane.f32.xlu0 %v386_v27 }
 0x198   :  { %1359 = vmatpush3.bf16.xpose.msk.msra.mxu1 %vm1725_vm10, %v1354_v20  ;;  %393 = vadd.xlane.f32.xlu1 %v392_v30 }
 0x199   :  { %v1360_v31 = vpack.c.bf16 %v1423_v28, %v1422_v29 }
 0x19b   :  { %1362 = vmatprep.subr.msk.bf16.mxu1 %vm1725_vm10, %v1360_v31 }
 0x19e   :  { %v524_v38 = vpop.permute.xlu0 %523  ;;  %v527_v39 = vpop.permute.xlu1 %526 }
 0x1a0   :  { %1365 = vmatpush3.bf16.xpose.msk.msra.mxu1 %vm1725_vm10, %v1360_v31 }
 0x1a1   :  { %1368 = vmatprep.subr.msk.bf16.mxu1 %vm1725_vm10, %v1366_v36 }
 0x1a2   :  { %v530_v40 = vpop.permute.xlu0 %529  ;;  %v533_v41 = vpop.permute.xlu1 %532 }
 0x1a6   :  { %v536_v42 = vpop.permute.xlu0 %535  ;;  %v539_v46 = vpop.permute.xlu1 %538 }
 0x1a8   :  { %1371 = vmatpush3.bf16.xpose.msk.msra.mxu1 %vm1725_vm10, %v1366_v36  ;;  %v675_v36 = vld [vmem:[%s1901_s4] sm:$0xff] }
 0x1a9   :  { %544 = vrot.lane.b32.xlu1 %v1709_v57, %s1556_s28 }
 0x1ad   :  { %541 = vrot.lane.b32.xlu0 %v1709_v57, %s1557_s1  ;;  %v547_v57 = vsel %vm225_vm9, %v524_v38, %v527_v39  ;;  %s1558_s1 = smov [#allocation7]  }
 0x1ae   :  { %v549_v59 = vsel %vm548_vm11, %v547_v57, %v530_v40  ;;  %v680_v57 = vld [vmem:[%s1901_s4 + $0x28] sm:$0xff]  ;;  %s1126_s17 = sshll.u32 %s1558_s1, 4  ;;  %s1127_s17 = int_to_ptr.vmem [resolvable:$true] %s1126_s17 }
 0x1af   :  { %1279 = vmatmul.mubr.msk.f32.vlgmr.msra.gmra.mrb[0].mxu1 %vm225_vm9, %v196_v62  ;;  %v551_v0 = vsel %vm550_vm12, %v549_v59, %v533_v41  ;;  %s1518_s23 = scalar_lea.vmem %s1127_s17, 1024  ;;  %p1523_p3 = scmp.lt.s32.totalorder %s1127_s17, %s1127_s17 }
 0x1b0   :  { %1281 = vmatprep.mubr.msk.f32.mxu1 %vm225_vm9, %v198_v58  ;;  %v553_v2 = vsel %vm552_vm13, %v551_v0, %v536_v42  ;;  %p1519_p2 = scmp.ne.s32.totalorder %s1127_s17, %s1518_s23  ;;  %p1524_p4 = scmp.lt.s32.totalorder %s1518_s23, %s1518_s23 }
 0x1b2   :  { %p1525_p5 = por %p1524_p4, %p1523_p3 }
 0x1b3   :  { %1282 = vmatmul.mubr.msk.f32.gmra.mrb[2].mxu1 %vm225_vm9, %v200_v61 }
 0x1b4   :  { %1284 = vmatprep.mubr.msk.f32.mxu1 %vm225_vm9, %v202_v23  ;;  %p1526_p6 = pnand %p1525_p5, %p1519_p2 }
 0x1b7   :  { %1285 = vmatmul.mubr.msk.f32.gmra.mrb[4].mxu1 %vm225_vm9, %v204_v25 }
 0x1b8   :  { %1287 = vmatprep.mubr.msk.f32.mxu1 %vm225_vm9, %v206_v19  ;;  %v555_v19 = vsel %vm554_vm14, %v553_v2, %v539_v46 }
 0x1bb   :  { %1288 = vmatmul.mubr.msk.f32.gmra.mrb[6].mxu1 %vm225_vm9, %v208_v17 }
 0x210   :  { %v379_v44 = vpop.xlane.xlu0 %378 }
 0x211   :  { %v473_v58 = vrot.slane %v379_v44, %v464_v51  ;;  %v677_v44 = vld [vmem:[%s1901_s4 + $0x10] sm:$0xff] }
 0x214   :  { %v373_v49 = vpop.xlane.xlu0 %372 }
 0x215   :  { %v376_v50 = vpop.xlane.xlu1 %375  ;;  %v465_v52 = vrot.slane %v373_v49, %v464_v51 }
 0x216   :  { %v469_v53 = vrot.slane %v376_v50, %v464_v51 }
 0x218   :  { %v382_v55 = vpop.xlane.xlu0 %381  ;;  %v495_v56 = vsel %vm494_vm2, %v469_v53, %v465_v52  ;;  %v679_v53 = vld [vmem:[%s1901_s4 + $0x20] sm:$0xff] }
 0x219   :  { %v477_v60 = vrot.slane %v382_v55, %v464_v51  ;;  %v497_v62 = vsel %vm496_vm3, %v473_v58, %v495_v56 }
 0x21b   :  { %v499_v5 = vsel %vm498_vm4, %v477_v60, %v497_v62  ;;  %v681_v62 = vld [vmem:[%s1901_s4 + $0x30] sm:$0xff] }
 0x21d   :  { %v391_v54 = vpop.xlane.xlu1 %390 }
 0x21e   :  { %v489_v12 = vrot.slane %v391_v54, %v464_v51 }
 0x221   :  { %v385_v61 = vpop.xlane.xlu1 %384 }
 0x222   :  { %v481_v63 = vrot.slane %v385_v61, %v464_v51 }
 0x224   :  { %v388_v1 = vpop.xlane.xlu0 %387  ;;  %v501_v15 = vsel %vm500_vm5, %v481_v63, %v499_v5  ;;  %v682_v5 = vld [vmem:[%s1901_s4 + $0x38] sm:$0xff] }
 0x225   :  { %v485_v6 = vrot.slane %v388_v1, %v464_v51  ;;  %v394_v11 = vpop.xlane.xlu1 %393 }
 0x226   :  { %v493_v16 = vrot.slane %v394_v11, %v464_v51 }
 0x227   :  { %v503_v17 = vsel %vm502_vm6, %v485_v6, %v501_v15 }
 0x228   :  { %v505_v18 = vsel %vm504_vm7, %v489_v12, %v503_v17  ;;  %v542_v20 = vpop.permute.xlu0 %541 }
 0x229   :  { %v507_v21 = vsel %vm506_vm8, %v493_v16, %v505_v18  ;;  %v557_v22 = vsel %vm556_vm15, %v555_v19, %v542_v20  ;;  %v545_v23 = vpop.permute.xlu1 %544 }
 0x22a   :  { %1292 = vmatprep.mubr.msk.f32.mxu0 %vm225_vm9, %v507_v21  ;;  %v559_v24 = vsel %vm558_vm1, %v557_v22, %v545_v23 }
 0x22b   :  { %1290 = vmatprep.subr.mxu0 %v559_v24 }
 0x22c   :  { %1291 = vmatpush3.msra.mxu0 %v559_v24 }
 0x22d   :  { %1293 = vmatmul.mubr.msk.f32.vlgmr.msra.gmra.mrb[8].mxu0 %vm225_vm9, %v507_v21  ;;  %1373 = vmatprep.subr.bf16.mxu0 %v1683_v45 }
 0x22e   :  { %1295 = vmatprep.mubr.msk.f32.mxu0 %vm225_vm9, %v507_v21  ;;  %1375 = vmatpush3.bf16.msra.mxu0 %v1683_v45 }
 0x22f   :  { %1377 = vmatprep.subr.bf16.mxu0 %v1679_v35 }
 0x231   :  { %1296 = vmatmul.mubr.msk.f32.gmra.mrb[10].mxu0 %vm225_vm9, %v507_v21 }
 0x232   :  { %1298 = vmatprep.mubr.msk.f32.mxu0 %vm225_vm9, %v507_v21  ;;  %1379 = vmatpush3.bf16.msra.mxu0 %v1679_v35 }
 0x233   :  { %1381 = vmatprep.subr.bf16.mxu0 %v1694_v32 }
 0x235   :  { %1299 = vmatmul.mubr.msk.f32.gmra.mrb[12].mxu0 %vm225_vm9, %v507_v21 }
 0x236   :  { %1301 = vmatprep.mubr.msk.f32.mxu0 %vm225_vm9, %v507_v21  ;;  %1383 = vmatpush3.bf16.msra.mxu0 %v1694_v32 }
 0x237   :  { %1385 = vmatprep.subr.bf16.mxu0 %v1698_v37 }
 0x239   :  { %1302 = vmatmul.mubr.msk.f32.gmra.mrb[14].mxu0 %vm225_vm9, %v507_v21 }
 0x23a   :  { %1387 = vmatpush3.bf16.msra.mxu0 %v1698_v37 }
 0x282   :  { %v1280_v45 = vpop.f32.mrb[0].mxu1 }
 0x283   :  { %v324_v25 = vpop.f32.mrb[1].mxu1 }
 0x286   :  { %v1283_v26 = vpop.f32.mrb[2].mxu1 }
 0x287   :  { %v334_v27 = vpop.f32.mrb[3].mxu1 }
 0x28a   :  { %v1286_v28 = vpop.f32.mrb[4].mxu1 }
 0x28b   :  { %v344_v35 = vpop.f32.mrb[5].mxu1 }
 0x28e   :  { %v1289_v29 = vpop.f32.mrb[6].mxu1 }
 0x28f   :  { %v354_v30 = vpop.f32.mrb[7].mxu1 }
 0x300   :  { %v1294_v31 = vpop.f32.mrb[8].mxu0 }
 0x301   :  { %v668_v32 = vsub.f32 %v1280_v45, %v1294_v31  ;;  %v628_v34 = vpop.f32.mrb[9].mxu0 }
 0x302   :  { %v667_v37 = vsub.f32 %v324_v25, %v628_v34 }
 0x303   :  { %v684_v38 = vadd.f32 %v676_v33, %v668_v32 }
 0x304   :  { %v1297_v39 = vpop.f32.mrb[10].mxu0  ;;  %v683_v40 = vadd.f32 %v675_v36, %v667_v37 }
 0x305   :  { %v670_v41 = vsub.f32 %v1283_v26, %v1297_v39  ;;  %v638_v42 = vpop.f32.mrb[11].mxu0  ;;  %v694_v43 = vsel %vm99_vm0, %v684_v38, -inf }
 0x306   :  { %v669_v46 = vsub.f32 %v334_v27, %v638_v42  ;;  %695 = vmax.xlane.f32.xlu1 %v694_v43  ;;  %v691_v47 = vsel %vm99_vm0, %v683_v40, -inf }
 0x307   :  { %692 = vmax.xlane.f32.xlu0 %v691_v47  ;;  %v686_v56 = vadd.f32 %v678_v48, %v670_v41 }
 0x308   :  { %v1300_v49 = vpop.f32.mrb[12].mxu0  ;;  %v685_v50 = vadd.f32 %v677_v44, %v669_v46 }
 0x309   :  { %v672_v51 = vsub.f32 %v1286_v28, %v1300_v49  ;;  %v648_v52 = vpop.f32.mrb[13].mxu0  ;;  %v700_v0 = vsel %vm99_vm0, %v686_v56, -inf }
 0x30a   :  { %v671_v54 = vsub.f32 %v344_v35, %v648_v52  ;;  %v697_v55 = vsel %vm99_vm0, %v685_v50, -inf }
 0x30b   :  { %698 = vmax.xlane.f32.xlu0 %v697_v55  ;;  %v688_v2 = vadd.f32 %v680_v57, %v672_v51 }
 0x30c   :  { %v1303_v58 = vpop.f32.mrb[14].mxu0  ;;  %v687_v59 = vadd.f32 %v679_v53, %v671_v54 }
 0x30d   :  { %v674_v60 = vsub.f32 %v1289_v29, %v1303_v58  ;;  %v658_v61 = vpop.f32.mrb[15].mxu0  ;;  %v706_v11 = vsel %vm99_vm0, %v688_v2, -inf }
 0x30e   :  { %v673_v63 = vsub.f32 %v354_v30, %v658_v61  ;;  %v703_v1 = vsel %vm99_vm0, %v687_v59, -inf }
 0x30f   :  { %701 = vmax.xlane.f32.xlu0 %v700_v0  ;;  %704 = vmax.xlane.f32.xlu1 %v703_v1  ;;  %v690_v15 = vadd.f32 %v682_v5, %v674_v60 }
 0x310   :  { %v689_v6 = vadd.f32 %v681_v62, %v673_v63 }
 0x311   :  { %v712_v16 = vsel %vm99_vm0, %v690_v15, -inf }
 0x312   :  { %v709_v12 = vsel %vm99_vm0, %v689_v6, -inf }
 0x313   :  { %707 = vmax.xlane.f32.xlu0 %v706_v11  ;;  %710 = vmax.xlane.f32.xlu1 %v709_v12 }
 0x317   :  { %713 = vmax.xlane.f32.xlu0 %v712_v16 }
 0x393   :  { %v696_v17 = vpop.xlane.xlu1 %695 }
 0x394   :  { %v716_v18 = vsub.f32 %v684_v38, %v696_v17  ;;  %v693_v19 = vpop.xlane.xlu0 %692 }
 0x395   :  { %v715_v20 = vsub.f32 %v683_v40, %v693_v19 }
 0x396   :  { %v725_v21 = vmul.f32 1.442695, %v716_v18 }
 0x397   :  { %v723_v22 = vmul.f32 1.442695, %v715_v20 }
 0x398   :  { %1432 = vpow2.f32 %v725_v21  ;;  %v699_v23 = vpop.xlane.xlu0 %698 }
 0x399   :  { %1434 = vpow2.f32 %v723_v22  ;;  %v717_v24 = vsub.f32 %v685_v50, %v699_v23 }
 0x39b   :  { %v727_v45 = vmul.f32 1.442695, %v717_v24 }
 0x39c   :  { %v702_v25 = vpop.xlane.xlu0 %701  ;;  %v705_v26 = vpop.xlane.xlu1 %704 }
 0x39d   :  { %1436 = vpow2.f32 %v727_v45  ;;  %v718_v27 = vsub.f32 %v686_v56, %v702_v25  ;;  %v719_v28 = vsub.f32 %v687_v59, %v705_v26 }
 0x39f   :  { %v729_v35 = vmul.f32 1.442695, %v718_v27  ;;  %v731_v29 = vmul.f32 1.442695, %v719_v28 }
 0x3a0   :  { %v708_v30 = vpop.xlane.xlu0 %707  ;;  %v711_v31 = vpop.xlane.xlu1 %710 }
 0x3a1   :  { %1438 = vpow2.f32 %v729_v35  ;;  %v720_v33 = vsub.f32 %v688_v2, %v708_v30  ;;  %v721_v32 = vsub.f32 %v689_v6, %v711_v31 }
 0x3a2   :  { %v1433_v34 = vpop.eup %1432  ;;  %1440 = vpow2.f32 %v731_v29 }
 0x3a3   :  { %v1435_v36 = vpop.eup %1434  ;;  %v733_v37 = vmul.f32 1.442695, %v720_v33  ;;  %v735_v38 = vmul.f32 1.442695, %v721_v32  ;;  %v742_v39 = vsel %vm99_vm0, %v1433_v34, 0.0 }
 0x3a4   :  { %743 = vadd.xlane.f32.xlu0 %v742_v39  ;;  %v714_v40 = vpop.xlane.xlu0 %713  ;;  %v739_v41 = vsel %vm99_vm0, %v1435_v36, 0.0 }
 0x3a5   :  { %1442 = vpow2.f32 %v733_v37  ;;  %v722_v42 = vsub.f32 %v690_v15, %v714_v40  ;;  %740 = vadd.xlane.f32.xlu1 %v739_v41 }
 0x3a6   :  { %1444 = vpow2.f32 %v735_v38 }
 0x3a7   :  { %v1437_v43 = vpop.eup %1436  ;;  %v737_v44 = vmul.f32 1.442695, %v722_v42 }
 0x3a8   :  { %v745_v46 = vsel %vm99_vm0, %v1437_v43, 0.0 }
 0x3a9   :  { %1446 = vpow2.f32 %v737_v44  ;;  %746 = vadd.xlane.f32.xlu1 %v745_v46 }
 0x3ab   :  { %v1439_v47 = vpop.eup %1438 }
 0x3ac   :  { %v1441_v48 = vpop.eup %1440  ;;  %v748_v49 = vsel %vm99_vm0, %v1439_v47, 0.0 }
 0x3ad   :  { %749 = vadd.xlane.f32.xlu0 %v748_v49  ;;  %v751_v50 = vsel %vm99_vm0, %v1441_v48, 0.0 }
 0x3ae   :  { %752 = vadd.xlane.f32.xlu1 %v751_v50 }
 0x3af   :  { %v1443_v51 = vpop.eup %1442 }
 0x3b0   :  { %v1445_v52 = vpop.eup %1444  ;;  %v754_v53 = vsel %vm99_vm0, %v1443_v51, 0.0 }
 0x3b1   :  { %755 = vadd.xlane.f32.xlu0 %v754_v53  ;;  %v757_v54 = vsel %vm99_vm0, %v1445_v52, 0.0 }
 0x3b2   :  { %758 = vadd.xlane.f32.xlu1 %v757_v54 }
 0x3b3   :  { %v1447_v55 = vpop.eup %1446 }
 0x3b4   :  { %v760_v56 = vsel %vm99_vm0, %v1447_v55, 0.0 }
 0x3b5   :  { %761 = vadd.xlane.f32.xlu0 %v760_v56  ;;  %v1428_v56 = vld [vmem:[#allocation5] sm:$0xff]  }
 0x3b6   :  { %1332 = vmatprep.subr.bf16.mxu1 %v1428_v56 }
 0x3b7   :  { %1333 = vmatpush3.bf16.msra.mxu1 %v1428_v56 }
 0x431   :  { %v744_v57 = vpop.xlane.xlu0 %743 }
 0x432   :  { %1448 = vrcp.f32 %v744_v57  ;;  %v741_v58 = vpop.xlane.xlu1 %740  ;;  %v1429_v57 = vld [vmem:[#allocation5 + $0x8] sm:$0xff]  }
 0x433   :  { %1450 = vrcp.f32 %v741_v58  ;;  %1334 = vmatprep.subr.bf16.mxu1 %v1429_v57 }
 0x434   :  { %1335 = vmatpush3.bf16.msra.mxu1 %v1429_v57 }
 0x436   :  { %v747_v59 = vpop.xlane.xlu1 %746 }
 0x437   :  { %1452 = vrcp.f32 %v747_v59 }
 0x43a   :  { %v750_v60 = vpop.xlane.xlu0 %749 }
 0x43b   :  { %1454 = vrcp.f32 %v750_v60  ;;  %v753_v61 = vpop.xlane.xlu1 %752 }
 0x43c   :  { %v1449_v62 = vpop.eup %1448  ;;  %1456 = vrcp.f32 %v753_v61 }
 0x43d   :  { %v1451_v63 = vpop.eup %1450  ;;  %v772_v2 = vmul.f32 %v1449_v62, %v1433_v34 }
 0x43e   :  { %v756_v0 = vpop.xlane.xlu0 %755  ;;  %v771_v1 = vmul.f32 %v1451_v63, %v1435_v36 }
 0x43f   :  { %1458 = vrcp.f32 %v756_v0  ;;  %v759_v5 = vpop.xlane.xlu1 %758  ;;  %v780_v16 = vsel %vm99_vm0, %v772_v2, 0.0 }
 0x440   :  { %1460 = vrcp.f32 %v759_v5  ;;  %v779_v15 = vsel %vm99_vm0, %v771_v1, 0.0  ;;  %v1431_v5 = vld [vmem:[#allocation5 + $0x18] sm:$0xff]  }
 0x441   :  { %v1453_v6 = vpop.eup %1452  ;;  %v781_v19 = vadd.f32 %v780_v16, %v779_v15 }
 0x442   :  { %v762_v11 = vpop.xlane.xlu0 %761  ;;  %v773_v12 = vmul.f32 %v1453_v6, %v1437_v43 }
 0x443   :  { %1462 = vrcp.f32 %v762_v11 }
 0x444   :  { %v782_v17 = vsel %vm99_vm0, %v773_v12, 0.0 }
 0x445   :  { %v1455_v18 = vpop.eup %1454  ;;  %v783_v23 = vadd.f32 %v782_v17, %v781_v19 }
 0x446   :  { %v1457_v20 = vpop.eup %1456  ;;  %v774_v21 = vmul.f32 %v1455_v18, %v1439_v47 }
 0x447   :  { %v775_v22 = vmul.f32 %v1457_v20, %v1441_v48 }
 0x448   :  { %v784_v24 = vsel %vm99_vm0, %v774_v21, 0.0 }
 0x449   :  { %v1459_v45 = vpop.eup %1458  ;;  %v785_v25 = vadd.f32 %v784_v24, %v783_v23  ;;  %v786_v28 = vsel %vm99_vm0, %v775_v22, 0.0 }
 0x44a   :  { %v1461_v26 = vpop.eup %1460  ;;  %v776_v27 = vmul.f32 %v1459_v45, %v1443_v51 }
 0x44b   :  { %v777_v35 = vmul.f32 %v1461_v26, %v1445_v52  ;;  %v787_v29 = vadd.f32 %v786_v28, %v785_v25 }
 0x44c   :  { %v788_v30 = vsel %vm99_vm0, %v776_v27, 0.0 }
 0x44d   :  { %v1463_v31 = vpop.eup %1462  ;;  %v789_v33 = vadd.f32 %v788_v30, %v787_v29  ;;  %v790_v32 = vsel %vm99_vm0, %v777_v35, 0.0 }
 0x44e   :  { %v778_v34 = vmul.f32 %v1463_v31, %v1447_v55 }
 0x44f   :  { %v791_v36 = vadd.f32 %v790_v32, %v789_v33 }
 0x450   :  { %v792_v37 = vsel %vm99_vm0, %v778_v34, 0.0 }
 0x451   :  { %v793_v38 = vadd.f32 %v792_v37, %v791_v36  ;;  %v1467_v37 = vld [vmem:[%s1897_s0] sm:$0xff] }
 0x453   :  { %v794_v39 = vrot.slane %v793_v38, 4 }
 0x455   :  { %v795_v40 = vadd.f32 %v794_v39, %v793_v38 }
 0x457   :  { %v796_v41 = vrot.slane %v795_v40, 2 }
 0x459   :  { %v797_v42 = vadd.f32 %v796_v41, %v795_v40  ;;  %v1468_v40 = vld [vmem:[%s1897_s0 + $0x18] sm:$0xff] }
 0x45b   :  { %v798_v43 = vrot.slane %v797_v42, 1 }
 0x45d   :  { %v799_v44 = vadd.f32 %v798_v43, %v797_v42  ;;  %v1469_v42 = vld [vmem:[%s1897_s0 + $0x8] sm:$0xff] }
 0x45f   :  { %v800_v46 = vadd.f32 1e-09, %v799_v44 }
 0x461   :  { %1464 = vrcp.f32 %v800_v46 }
 0x46b   :  { %v1465_v47 = vpop.eup %1464 }
 0x46c   :  { %v802_v48 = vmul.f32 %v1465_v47, %v771_v1  ;;  %v803_v49 = vmul.f32 %v1465_v47, %v772_v2  ;;  %v804_v50 = vmul.f32 %v1465_v47, %v773_v12  ;;  %v805_v51 = vmul.f32 %v1465_v47, %v774_v21  ;;  %v1430_v2 = vld [vmem:[#allocation5 + $0x10] sm:$0xff]  }
 0x46d   :  { %v806_v52 = vmul.f32 %v1465_v47, %v775_v22  ;;  %v807_v53 = vmul.f32 %v1465_v47, %v776_v27  ;;  %v808_v54 = vmul.f32 %v1465_v47, %v777_v35  ;;  %v809_v55 = vmul.f32 %v1465_v47, %v778_v34  ;;  %1336 = vmatprep.subr.bf16.mxu1 %v1430_v2 }
 0x46e   :  { %810 = vxpose.xlu1.b32.start [1/8] (short) (narrow) %v802_v48, 64  ;;  %1337 = vmatpush3.bf16.msra.mxu1 %v1430_v2 }
 0x46f   :  { %1338 = vmatprep.subr.bf16.mxu1 %v1431_v5 }
 0x472   :  { %811 = vxpose.xlu1.b32.cont [2/8] (short) (narrow) %v803_v49, 64  ;;  %1339 = vmatpush3.bf16.msra.mxu1 %v1431_v5 }
 0x476   :  { %812 = vxpose.xlu1.b32.cont [3/8] (short) (narrow) %v804_v50, 64 }
 0x47a   :  { %813 = vxpose.xlu1.b32.cont [4/8] (short) (narrow) %v805_v51, 64 }
 0x47e   :  { %814 = vxpose.xlu1.b32.cont [5/8] (short) (narrow) %v806_v52, 64 }
 0x482   :  { %815 = vxpose.xlu1.b32.cont [6/8] (short) (narrow) %v807_v53, 64 }
 0x486   :  { %816 = vxpose.xlu1.b32.cont [7/8] (short) (narrow) %v808_v54, 64 }
 0x48a   :  { %817 = vxpose.xlu1.b32.end [8/8] (short) (narrow) %v809_v55, 64  ;;  %v1470_v55 = vld [vmem:[%s1897_s0 + $0x30] sm:$0xff] }
 0x4ee   :  { %v826_v58 = vpop.trf.xlu1 }
 0x4ef   :  { %1320 = vmatprep.mubr.msk.f32.mxu0 %vm99_vm0, %v826_v58  ;;  %v1471_v58 = vld [vmem:[%s1897_s0 + $0x20] sm:$0xff] }
 0x4f2   :  { %v827_v59 = vpop.trf.xlu1 }
 0x4f3   :  { %1321 = vmatmul.mubr.msk.f32.vlgmr.msra.gmra.mrb[16].mxu0 %vm99_vm0, %v827_v59 }
 0x4f6   :  { %v828_v60 = vpop.trf.xlu1 }
 0x4f7   :  { %1323 = vmatprep.mubr.msk.f32.mxu0 %vm99_vm0, %v828_v60 }
 0x4fa   :  { %v829_v61 = vpop.trf.xlu1 }
 0x4fb   :  { %1324 = vmatmul.mubr.msk.f32.gmra.mrb[18].mxu0 %vm99_vm0, %v829_v61  ;;  %v1472_v61 = vld [vmem:[%s1897_s0 + $0x38] sm:$0xff] }
 0x4fe   :  { %v830_v62 = vpop.trf.xlu1 }
 0x4ff   :  { %1326 = vmatprep.mubr.msk.f32.mxu0 %vm99_vm0, %v830_v62 }
 0x502   :  { %v831_v63 = vpop.trf.xlu1 }
 0x503   :  { %1327 = vmatmul.mubr.msk.f32.gmra.mrb[20].mxu0 %vm99_vm0, %v831_v63  ;;  %v1473_v63 = vld [vmem:[%s1897_s0 + $0x28] sm:$0xff] }
 0x506   :  { %v832_v0 = vpop.trf.xlu1 }
 0x507   :  { %1329 = vmatprep.mubr.msk.f32.mxu0 %vm99_vm0, %v832_v0 }
 0x50a   :  { %v833_v1 = vpop.trf.xlu1 }
 0x50b   :  { %1330 = vmatmul.mubr.msk.f32.gmra.mrb[22].mxu0 %vm99_vm0, %v833_v1 }
 0x5c6   :  { %v1322_v6 = vpop.f32.mrb[16].mxu0 }
 0x5c7   :  { %v972_v11 = vsub.f32 %v1627_v4, %v1322_v6  ;;  %v932_v12 = vpop.f32.mrb[17].mxu0 }
 0x5c8   :  { %v971_v15 = vsub.f32 %v1622_v3, %v932_v12 }
 0x5ca   :  { %v979_v16 = vpack.c.bf16 %v972_v11, %v971_v15 }
 0x5cc   :  { %1340 = vmatprep.mubr.msk.bf16.mxu1 %vm99_vm0, %v979_v16 }
 0x5ce   :  { %v1325_v17 = vpop.f32.mrb[18].mxu0 }
 0x5cf   :  { %v974_v18 = vsub.f32 %v1640_v8, %v1325_v17  ;;  %v942_v19 = vpop.f32.mrb[19].mxu0 }
 0x5d0   :  { %v973_v20 = vsub.f32 %v1635_v7, %v942_v19  ;;  %v1180_v7 = vld [vmem:[%s1900_s3 + $0x1] ss:$0 sm:$0xff] }
 0x5d2   :  { %v980_v21 = vpack.c.bf16 %v974_v18, %v973_v20 }
 0x5d4   :  { %1341 = vmatmul.mubr.msk.bf16.vlgmr.msra.gmra.mrb[8].mxu1 %vm99_vm0, %v980_v21 }
 0x5d6   :  { %v1328_v22 = vpop.f32.mrb[20].mxu0 }
 0x5d7   :  { %v976_v23 = vsub.f32 %v1650_v10, %v1328_v22  ;;  %v952_v24 = vpop.f32.mrb[21].mxu0 }
 0x5d8   :  { %v975_v4 = vsub.f32 %v1645_v9, %v952_v24 }
 0x5da   :  { %v981_v45 = vpack.c.bf16 %v976_v23, %v975_v4 }
 0x5dc   :  { %1344 = vmatprep.mubr.msk.bf16.mxu1 %vm99_vm0, %v981_v45 }
 0x5de   :  { %v1331_v3 = vpop.f32.mrb[22].mxu0 }
 0x5df   :  { %v978_v25 = vsub.f32 %v1666_v14, %v1331_v3  ;;  %v962_v26 = vpop.f32.mrb[23].mxu0 }
 0x5e0   :  { %v977_v8 = vsub.f32 %v1661_v13, %v962_v26  ;;  %v1466_v13 = vld [vmem:[%s1897_s0 + $0x10] sm:$0xff] }
 0x5e2   :  { %v982_v27 = vpack.c.bf16 %v978_v25, %v977_v8 }
 0x5e4   :  { %1345 = vmatmul.mubr.msk.bf16.gmra.mrb[12].mxu1 %vm99_vm0, %v982_v27 }
 0x6a7   :  { %v1342_v10 = vpop.f32.mrb[8].mxu1 }
 0x6a8   :  { %v1075_v28 = vadd.f32 %v1342_v10, %v1180_v7  ;;  %v1066_v35 = vpop.f32.mrb[9].mxu1 }
 0x6a9   :  { %v1067_v9 = vadd.f32 %v1180_v7, %v1066_v35  ;;  %v1343_v29 = vpop.f32.mrb[10].mxu1 }
 0x6aa   :  { %v1099_v30 = vmax.f32 %v1075_v28, 0.0  ;;  %v1078_v31 = vadd.f32 %v1343_v29, %v1180_v7  ;;  %v1069_v33 = vpop.f32.mrb[11].mxu1 }
 0x6ab   :  { %v1097_v32 = vmax.f32 %v1067_v9, 0.0  ;;  %v1070_v14 = vadd.f32 %v1180_v7, %v1069_v33 }
 0x6ac   :  { %v1107_v34 = vadd.f32 %v1466_v13, %v1099_v30  ;;  %v1100_v36 = vmax.f32 %v1078_v31, 0.0 }
 0x6ad   :  { %v1105_v38 = vadd.f32 %v1467_v37, %v1097_v32  ;;  %v1098_v39 = vmax.f32 %v1070_v14, 0.0 }
 0x6ae   :  { %1115 = vst.msk [vmem:[#allocation7 + $0x10] sm:$0xff] %vm99_vm0, %v1107_v34  ;;  %v1108_v41 = vadd.f32 %v1468_v40, %v1100_v36 }
 0x6af   :  { %1113 = vst.msk [vmem:[#allocation7] sm:$0xff] %vm99_vm0, %v1105_v38  ;;  %v1106_v43 = vadd.f32 %v1469_v42, %v1098_v39 }
 0x6b0   :  { %1116 = vst.msk [vmem:[#allocation7 + $0x18] sm:$0xff] %vm99_vm0, %v1108_v41 }
 0x6b1   :  { %1114 = vst.msk [vmem:[#allocation7 + $0x8] sm:$0xff] %vm99_vm0, %v1106_v43 }
 0x6b7   :  { %v1346_v44 = vpop.f32.mrb[12].mxu1 }
 0x6b8   :  { %v1091_v46 = vadd.f32 %v1346_v44, %v1180_v7  ;;  %v1082_v47 = vpop.f32.mrb[13].mxu1 }
 0x6b9   :  { %v1083_v48 = vadd.f32 %v1180_v7, %v1082_v47  ;;  %v1347_v49 = vpop.f32.mrb[14].mxu1 }
 0x6ba   :  { %v1103_v50 = vmax.f32 %v1091_v46, 0.0  ;;  %v1094_v51 = vadd.f32 %v1347_v49, %v1180_v7  ;;  %v1085_v52 = vpop.f32.mrb[15].mxu1 }
 0x6bb   :  { %v1101_v53 = vmax.f32 %v1083_v48, 0.0  ;;  %v1086_v54 = vadd.f32 %v1180_v7, %v1085_v52 }
 0x6bc   :  { %v1111_v56 = vadd.f32 %v1470_v55, %v1103_v50  ;;  %v1104_v57 = vmax.f32 %v1094_v51, 0.0 }
 0x6bd   :  { %v1109_v59 = vadd.f32 %v1471_v58, %v1101_v53  ;;  %v1102_v60 = vmax.f32 %v1086_v54, 0.0 }
 0x6be   :  { %1119 = vst.msk [vmem:[#allocation7 + $0x30] sm:$0xff] %vm99_vm0, %v1111_v56  ;;  %v1112_v62 = vadd.f32 %v1472_v61, %v1104_v57 }
 0x6bf   :  { %1117 = vst.msk [vmem:[#allocation7 + $0x20] sm:$0xff] %vm99_vm0, %v1109_v59  ;;  %v1110_v0 = vadd.f32 %v1473_v63, %v1102_v60 }
 0x6c0   :  { %1120 = vst.msk [vmem:[#allocation7 + $0x38] sm:$0xff] %vm99_vm0, %v1112_v62 }
 0x6c1   :  { %1118 = vst.msk [vmem:[#allocation7 + $0x28] sm:$0xff] %vm99_vm0, %v1110_v0 }
 0x6c2   :  { %1529 = shalt.err (!%p1526_p6)
}
 0x6c3   :  { %s1530_s26 = scalar_lea.hbm %s1902_s5, 1024 }
 0x6c4   :  { %p1531_p7 = scmp.ne.s32.totalorder %s1902_s5, %s1530_s26  ;;  %p1534_p8 = scmp.lt.u32.totalorder %s1530_s26, %s1902_s5 }
 0x6c6   :  { %p1536_p9 = pnand %p1534_p8, %p1531_p7 }
 0x6c8   :  { %1539 = shalt.err (!%p1536_p9)
}
 0x6c9   :  { %s1559_s6 = smov 128   ;;  %s1560_s7 = smov 8  }
 0x6ca   :  { %1132 = dma.vmem_to_hbm [thread:$0]  %s1127_s17, 1024, %s1902_s5, [#allocation4], %s1559_s6, %s1559_s6, %s1560_s7  }
 0x6cb   :  { %1544 = dma.done.wait [#allocation4], 1024  }
 0x6cc   :  { %1545 = vsyncadd [#allocation4], 4294966272 }
 0x6cd   :  { %1136 = vsyncpa [#allocation3], 1 }
 0x6ce   :  { %1137 = vsyncpa [#allocation6], 1 }
 0x6cf   :  { %1138 = vsyncpa [#allocation4], 1 }

</bundles_post_ra>
